<compile_context>
chip_gen: v7x
topology: tpu7x:2x2x1
jax: 0.10.0
libtpu: 0.0.40
codegen_flags: <defaults>
</compile_context>

<pallas_src>
import functools

import jax
import jax.numpy as jnp
from jax import lax
from jax.experimental import pallas as pl
from jax.experimental.pallas import tpu as pltpu


def _conv3x3_bias_mish_kernel(x_ref, w_ref, o_ref, xp_ref, p_ref, *,
                              H, W, Bt, approx_recip):
    """One grid step processes Bt batch elements.

    x_ref : (Bt, Cin, HW)        raw flattened input (no padding)
    w_ref : (Cout, 9*Cin + 1)    weights, column (ky*3+kx)*Cin + ci; bias last
    o_ref : (Bt, Cout, HW)       conv + bias + mish, lane-dense (HW lanes)
    xp_ref: (Bt, Cin, HW+2W+2)   scratch: zero-guarded copy (compute dtype)
    p_ref : (9*Cin + 1, Bt*HW)   scratch: im2col matrix + ones row (compute dtype)
    """
    cin = x_ref.shape[1]
    hw = H * W
    cdt = p_ref.dtype

    # W-border masks: a lane-shifted tap window must not wrap into the
    # neighbouring image row.  col = w coordinate of each lane.
    col = lax.broadcasted_iota(jnp.int32, (1, hw), 1) % W
    m_lo = (col >= 1).astype(cdt)          # valid where w-1 >= 0   (kx == 0 taps)
    m_hi = (col <= W - 2).astype(cdt)      # valid where w+1 <  W   (kx == 2 taps)

    # Zero-guarded input copies: [W+1 zeros | x (HW) | W+1 zeros].  The guards
    # reproduce Conv2d's H zero-padding; W borders are handled by the masks.
    zeros_g = jnp.zeros((cin, W + 1), cdt)
    for b in range(Bt):
        xp_ref[b, :, pl.ds(0, W + 1)] = zeros_g
        xp_ref[b, :, pl.ds(W + 1 + hw, W + 1)] = zeros_g
        xp_ref[b, :, pl.ds(W + 1, hw)] = x_ref[b].astype(cdt)

    # Constant ones row -> matched by the bias column of w_ref (bias fold).
    p_ref[pl.ds(9 * cin, 1), :] = jnp.ones((1, Bt * hw), cdt)

    # Build the im2col buffer: every 3x3 tap is a pure lane-offset window of the
    # zero-guarded flattened input (no per-tap relayout / reshape).
    for b in range(Bt):
        xpb = xp_ref[b]                                   # (Cin, HW + 2W + 2)
        for ky in range(3):
            for kx in range(3):
                tap = ky * 3 + kx
                patch = xpb[:, ky * W + kx: ky * W + kx + hw]      # (Cin, HW)
                if kx == 0:
                    patch = patch * m_lo
                elif kx == 2:
                    patch = patch * m_hi
                p_ref[pl.ds(tap * cin, cin), pl.ds(b * hw, hw)] = patch

    # Single fused MXU matmul, K = 9*Cin + 1 (bias folded), f32 accumulation.
    acc = jnp.dot(w_ref[...], p_ref[...],
                  preferred_element_type=jnp.float32)     # (Cout, Bt*HW) f32

    # mish(x) = x * tanh(softplus(x)) = x * n / (n + 2),  n = e^x * (e^x + 2).
    # One EUP exp; clamp keeps n finite (for x > 20, n/(n+2) == 1 anyway).
    e = jnp.exp(jnp.minimum(acc, 20.0))
    n = e * (e + 2.0)
    out = acc * n * pl.reciprocal(n + 2.0, approx=approx_recip)

    # Lane-dense (HW lanes) unmasked stores, one per folded batch element.
    for b in range(Bt):
        o_ref[b] = out[:, b * hw:(b + 1) * hw].astype(o_ref.dtype)


def _auto_batch_tile(n_batch):
    """v5e/v6e (single TC): fold the whole batch into one grid step.
    v7x (2 TCs/chip): keep 2 parallel grid steps so both cores get work."""
    kind = ""
    try:
        kind = jax.devices()[0].device_kind.lower()
    except Exception:
        pass
    if "7" in kind and n_batch >= 2 and n_batch % 2 == 0:
        return n_batch // 2
    return n_batch


@functools.partial(
    jax.jit,
    static_argnames=("up_scale", "compute_dtype", "batch_tile", "approx_recip"))
def _upsample_block_impl(x_nchw, weight, bias, *, up_scale, compute_dtype,
                         batch_tile, approx_recip):
    N, Cin, H, W = x_nchw.shape
    r = int(up_scale)
    Cout = Cin * r * r
    HW = H * W
    K = 9 * Cin + 1
    L = HW + 2 * W + 2
    Bt = int(batch_tile)
    assert N % Bt == 0
    assert weight.shape == (Cout, Cin, 3, 3)

    # Weights -> (Cout, 9*Cin), column index = (ky*3+kx)*Cin + ci, then append
    # the bias as an extra K column (matched by the in-kernel ones row).
    w2 = jnp.transpose(weight, (0, 2, 3, 1)).reshape(Cout, 9 * Cin)
    w2 = jnp.concatenate([w2, bias.reshape(Cout, 1)], axis=1).astype(compute_dtype)

    xf = x_nchw.reshape(N, Cin, HW)       # pure reshape; padding happens in-kernel

    kernel = functools.partial(_conv3x3_bias_mish_kernel,
                               H=H, W=W, Bt=Bt, approx_recip=approx_recip)

    x_isz = jnp.dtype(x_nchw.dtype).itemsize
    w_isz = jnp.dtype(compute_dtype).itemsize
    cost = pl.CostEstimate(
        flops=2 * N * HW * K * Cout,
        transcendentals=N * HW * Cout,
        bytes_accessed=(N * Cin * HW * x_isz      # input (read once, no pad copy)
                        + Cout * K * w_isz        # weights + bias
                        + N * Cout * HW * x_isz)) # output

    conv = pl.pallas_call(
        kernel,
        out_shape=jax.ShapeDtypeStruct((N, Cout, HW), x_nchw.dtype),
        grid_spec=pltpu.PrefetchScalarGridSpec(
            num_scalar_prefetch=0,
            grid=(N // Bt,),
            in_specs=[
                pl.BlockSpec((Bt, Cin, HW), lambda g: (g, 0, 0)),
                pl.BlockSpec((Cout, K), lambda g: (0, 0)),
            ],
            out_specs=pl.BlockSpec((Bt, Cout, HW), lambda g: (g, 0, 0)),
            scratch_shapes=[
                pltpu.VMEM((Bt, Cin, L), compute_dtype),    # zero-guarded input
                pltpu.VMEM((K, Bt * HW), compute_dtype),    # im2col + ones row
            ],
        ),
        compiler_params=pltpu.CompilerParams(
            dimension_semantics=("parallel",)),
        cost_estimate=cost,
    )(xf, w2)

    # Pixel shuffle + NCHW output in one XLA transpose pass (see TODO above):
    # conv[n, c*r*r + i*r + j, h*W + w] -> out[n, c, h*r+i, w*r+j]
    y = conv.reshape(N, Cin, r, r, H, W)
    y = jnp.transpose(y, (0, 1, 4, 2, 5, 3))
    return y.reshape(N, Cin, H * r, W * r)


def upsample_block(x_nchw, weight, bias, *, up_scale,
                   compute_dtype=jnp.bfloat16, batch_tile=None):
    """UpsampleBLock forward: conv3x3(pad=1) -> pixel_shuffle(r) -> mish.

    x_nchw : (N, Cin, H, W)
    weight : (Cout, Cin, 3, 3) with Cout = Cin * up_scale**2 (PyTorch layout)
    bias   : (Cout,)
    returns: (N, Cin, H*r, W*r)
    """
    N = x_nchw.shape[0]
    if batch_tile is None:
        batch_tile = _auto_batch_tile(N)
    if N % int(batch_tile) != 0:
        batch_tile = 1
    approx = jnp.dtype(compute_dtype) != jnp.dtype(jnp.float32)
    return _upsample_block_impl(x_nchw, weight, bias, up_scale=int(up_scale),
                                compute_dtype=compute_dtype,
                                batch_tile=int(batch_tile),
                                approx_recip=bool(approx))


def _reference(x_nchw, weight, bias, up_scale):
    """Pure-JAX reference (lax conv + pixel shuffle + mish) for validation."""
    out = lax.conv_general_dilated(
        x_nchw.astype(jnp.float32), weight.astype(jnp.float32),
        window_strides=(1, 1), padding=((1, 1), (1, 1)),
        dimension_numbers=("NCHW", "OIHW", "NCHW"))
    out = out + bias.astype(jnp.float32)[None, :, None, None]
    N, C, H, W = out.shape
    r = up_scale
    c = C // (r * r)
    y = out.reshape(N, c, r, r, H, W)
    y = jnp.transpose(y, (0, 1, 4, 2, 5, 3)).reshape(N, c, H * r, W * r)
    return y * jnp.tanh(jax.nn.softplus(y))


if __name__ == "__main__":
    key = jax.random.PRNGKey(0)
    N, Cin, H, W = 2, 4, 16, 16
    up_scale = 2
    Cout = Cin * up_scale ** 2

    kx_, kw_, kb_ = jax.random.split(key, 3)
    x = jax.random.normal(kx_, (N, Cin, H, W), dtype=jnp.float32)
    fan_in = Cin * 3 * 3
    bound = 1.0 / (fan_in ** 0.5)
    weight = jax.random.uniform(kw_, (Cout, Cin, 3, 3), jnp.float32, -bound, bound)
    bias = jax.random.uniform(kb_, (Cout,), jnp.float32, -bound, bound)

    ref = _reference(x, weight, bias, up_scale)
    out_shape = (N, Cin, H * up_scale, W * up_scale)

    # Exact f32 MXU path, auto batch tiling: tight tolerance.
    out_f32 = jax.block_until_ready(
        upsample_block(x, weight, bias, up_scale=up_scale,
                       compute_dtype=jnp.float32))
    assert out_f32.shape == out_shape, out_f32.shape
    assert jnp.allclose(out_f32, ref, atol=1e-4, rtol=1e-4), \
        float(jnp.max(jnp.abs(out_f32 - ref)))

    # f32 path with a per-batch grid (exercises the multi-step / v7x-style grid).
    out_f32_b1 = jax.block_until_ready(
        upsample_block(x, weight, bias, up_scale=up_scale,
                       compute_dtype=jnp.float32, batch_tile=1))
    assert jnp.allclose(out_f32_b1, ref, atol=1e-4, rtol=1e-4), \
        float(jnp.max(jnp.abs(out_f32_b1 - ref)))

    # Default bf16-MXU path (f32 accumulation, approx reciprocal): looser tol.
    out_bf16 = jax.block_until_ready(
        upsample_block(x, weight, bias, up_scale=up_scale))
    assert out_bf16.shape == out_shape, out_bf16.shape
    assert jnp.allclose(out_bf16, ref, atol=2e-2, rtol=2e-2), \
        float(jnp.max(jnp.abs(out_bf16 - ref)))

    print("KERNEL_OK")
</pallas_src>

<mosaic_0001>
module attributes {stable_mosaic.version = 11 : i64} {
  func.func @_conv3x3_bias_mish_kernel(%arg0: i32, %arg1: memref<2x4x256xf32, #tpu.memory_space<vmem>>, %arg2: memref<16x37xf32, #tpu.memory_space<vmem>>, %arg3: memref<2x16x256xf32, #tpu.memory_space<vmem>>, %arg4: memref<2x4x290xf32, #tpu.memory_space<vmem>>, %arg5: memref<37x512xf32, #tpu.memory_space<vmem>>) attributes {dimension_semantics = [#tpu.dimension_semantics<parallel>], iteration_bounds = array<i64: 1>, scalar_prefetch = 0 : i64, scratch_operands = 2 : i64, tpu.core_type = #tpu.core_type<tc>, window_params = [{transform_indices = @transform_0, window_bounds = array<i64: 2, 4, 256>}, {pipeline_mode = #tpu.pipeline_mode<synchronous>, transform_indices = @transform_1, window_bounds = array<i64: 16, 37>}, {transform_indices = @transform_2, window_bounds = array<i64: 2, 16, 256>}]} {
    %0 = tpu.iota {dimensions = array<i32: 1>} : vector<1x256xi32>
    %c16_i32 = arith.constant 16 : i32
    %c0_i32 = arith.constant 0 : i32
    %1 = arith.cmpi eq, %c16_i32, %c0_i32 : i32
    %c1_i32 = arith.constant 1 : i32
    %2 = arith.select %1, %c1_i32, %c16_i32 : i32
    %3 = vector.broadcast %2 : i32 to vector<1x256xi32>
    %4 = arith.remsi %0, %3 : vector<1x256xi32>
    %c0_i32_0 = arith.constant 0 : i32
    %5 = vector.broadcast %c0_i32_0 : i32 to vector<1x256xi32>
    %6 = arith.cmpi ne, %4, %5 : vector<1x256xi32>
    %c0_i32_1 = arith.constant 0 : i32
    %7 = vector.broadcast %c0_i32_1 : i32 to vector<1x256xi32>
    %8 = arith.cmpi slt, %4, %7 : vector<1x256xi32>
    %c0_i32_2 = arith.constant 0 : i32
    %9 = arith.cmpi slt, %2, %c0_i32_2 : i32
    %10 = vector.broadcast %9 : i1 to vector<1x256xi1>
    %11 = vector.broadcast %10 : vector<1x256xi1> to vector<1x256xi1>
    %12 = arith.xori %8, %11 : vector<1x256xi1>
    %13 = arith.andi %12, %6 : vector<1x256xi1>
    %14 = vector.broadcast %2 : i32 to vector<1x256xi32>
    %15 = arith.addi %4, %14 : vector<1x256xi32>
    %16 = arith.select %13, %15, %4 : vector<1x256xi1>, vector<1x256xi32>
    %c1_i32_3 = arith.constant 1 : i32
    %17 = vector.broadcast %c1_i32_3 : i32 to vector<1x256xi32>
    %18 = arith.cmpi sge, %16, %17 : vector<1x256xi32>
    %19 = arith.extui %18 : vector<1x256xi1> to vector<1x256xi32>
    %20 = arith.sitofp %19 : vector<1x256xi32> to vector<1x256xf32>
    %c14_i32 = arith.constant 14 : i32
    %21 = vector.broadcast %c14_i32 : i32 to vector<1x256xi32>
    %22 = arith.cmpi sle, %16, %21 : vector<1x256xi32>
    %23 = arith.extui %22 : vector<1x256xi1> to vector<1x256xi32>
    %24 = arith.sitofp %23 : vector<1x256xi32> to vector<1x256xf32>
    %cst = arith.constant 0.000000e+00 : f32
    %25 = vector.broadcast %cst : f32 to vector<4x17xf32>
    %c0 = arith.constant 0 : index
    %c0_4 = arith.constant 0 : index
    %c0_5 = arith.constant 0 : index
    %26 = vector.load %arg4[%c0, %c0_4, %c0_5] : memref<2x4x290xf32, #tpu.memory_space<vmem>>, vector<1x4x17xf32>
    %27 = vector.shape_cast %26 : vector<1x4x17xf32> to vector<4x17xf32>
    %28 = vector.shape_cast %25 : vector<4x17xf32> to vector<1x4x17xf32>
    tpu.vector_store %arg4[%c0, %c0_4, %c0_5], %28 {strides = array<i32>} : memref<2x4x290xf32, #tpu.memory_space<vmem>>, vector<1x4x17xf32>,
    %c0_6 = arith.constant 0 : index
    %c0_7 = arith.constant 0 : index
    %c273 = arith.constant 273 : index
    %29 = vector.load %arg4[%c0_6, %c0_7, %c273] : memref<2x4x290xf32, #tpu.memory_space<vmem>>, vector<1x4x17xf32>
    %30 = vector.shape_cast %29 : vector<1x4x17xf32> to vector<4x17xf32>
    %31 = vector.shape_cast %25 : vector<4x17xf32> to vector<1x4x17xf32>
    tpu.vector_store %arg4[%c0_6, %c0_7, %c273], %31 {strides = array<i32>} : memref<2x4x290xf32, #tpu.memory_space<vmem>>, vector<1x4x17xf32>,
    %c0_8 = arith.constant 0 : index
    %c0_9 = arith.constant 0 : index
    %c0_10 = arith.constant 0 : index
    %32 = vector.load %arg1[%c0_8, %c0_9, %c0_10] : memref<2x4x256xf32, #tpu.memory_space<vmem>>, vector<1x4x256xf32>
    %33 = vector.shape_cast %32 : vector<1x4x256xf32> to vector<4x256xf32>
    %c0_11 = arith.constant 0 : index
    %c0_12 = arith.constant 0 : index
    %c17 = arith.constant 17 : index
    %34 = vector.load %arg4[%c0_11, %c0_12, %c17] : memref<2x4x290xf32, #tpu.memory_space<vmem>>, vector<1x4x256xf32>
    %35 = vector.shape_cast %34 : vector<1x4x256xf32> to vector<4x256xf32>
    %36 = vector.shape_cast %33 : vector<4x256xf32> to vector<1x4x256xf32>
    tpu.vector_store %arg4[%c0_11, %c0_12, %c17], %36 {strides = array<i32>} : memref<2x4x290xf32, #tpu.memory_space<vmem>>, vector<1x4x256xf32>,
    %c1 = arith.constant 1 : index
    %c0_13 = arith.constant 0 : index
    %c0_14 = arith.constant 0 : index
    %37 = vector.load %arg4[%c1, %c0_13, %c0_14] : memref<2x4x290xf32, #tpu.memory_space<vmem>>, vector<1x4x17xf32>
    %38 = vector.shape_cast %37 : vector<1x4x17xf32> to vector<4x17xf32>
    %39 = vector.shape_cast %25 : vector<4x17xf32> to vector<1x4x17xf32>
    tpu.vector_store %arg4[%c1, %c0_13, %c0_14], %39 {strides = array<i32>} : memref<2x4x290xf32, #tpu.memory_space<vmem>>, vector<1x4x17xf32>,
    %c1_15 = arith.constant 1 : index
    %c0_16 = arith.constant 0 : index
    %c273_17 = arith.constant 273 : index
    %40 = vector.load %arg4[%c1_15, %c0_16, %c273_17] : memref<2x4x290xf32, #tpu.memory_space<vmem>>, vector<1x4x17xf32>
    %41 = vector.shape_cast %40 : vector<1x4x17xf32> to vector<4x17xf32>
    %42 = vector.shape_cast %25 : vector<4x17xf32> to vector<1x4x17xf32>
    tpu.vector_store %arg4[%c1_15, %c0_16, %c273_17], %42 {strides = array<i32>} : memref<2x4x290xf32, #tpu.memory_space<vmem>>, vector<1x4x17xf32>,
    %c1_18 = arith.constant 1 : index
    %c0_19 = arith.constant 0 : index
    %c0_20 = arith.constant 0 : index
    %43 = vector.load %arg1[%c1_18, %c0_19, %c0_20] : memref<2x4x256xf32, #tpu.memory_space<vmem>>, vector<1x4x256xf32>
    %44 = vector.shape_cast %43 : vector<1x4x256xf32> to vector<4x256xf32>
    %c1_21 = arith.constant 1 : index
    %c0_22 = arith.constant 0 : index
    %c17_23 = arith.constant 17 : index
    %45 = vector.load %arg4[%c1_21, %c0_22, %c17_23] : memref<2x4x290xf32, #tpu.memory_space<vmem>>, vector<1x4x256xf32>
    %46 = vector.shape_cast %45 : vector<1x4x256xf32> to vector<4x256xf32>
    %47 = vector.shape_cast %44 : vector<4x256xf32> to vector<1x4x256xf32>
    tpu.vector_store %arg4[%c1_21, %c0_22, %c17_23], %47 {strides = array<i32>} : memref<2x4x290xf32, #tpu.memory_space<vmem>>, vector<1x4x256xf32>,
    %cst_24 = arith.constant 1.000000e+00 : f32
    %48 = vector.broadcast %cst_24 : f32 to vector<1x512xf32>
    %c36 = arith.constant 36 : index
    %c0_25 = arith.constant 0 : index
    %49 = vector.load %arg5[%c36, %c0_25] : memref<37x512xf32, #tpu.memory_space<vmem>>, vector<1x512xf32>
    tpu.vector_store %arg5[%c36, %c0_25], %48 {strides = array<i32>} : memref<37x512xf32, #tpu.memory_space<vmem>>, vector<1x512xf32>,
    %c0_26 = arith.constant 0 : index
    %c0_27 = arith.constant 0 : index
    %c0_28 = arith.constant 0 : index
    %50 = vector.load %arg4[%c0_26, %c0_27, %c0_28] : memref<2x4x290xf32, #tpu.memory_space<vmem>>, vector<1x4x290xf32>
    %51 = vector.shape_cast %50 : vector<1x4x290xf32> to vector<4x290xf32>
    %52 = vector.extract_strided_slice %51 {offsets = [0, 0], sizes = [4, 256], strides = [1, 1]} : vector<4x290xf32> to vector<4x256xf32>
    %53 = vector.broadcast %20 : vector<1x256xf32> to vector<4x256xf32>
    %54 = arith.mulf %52, %53 : vector<4x256xf32>
    %c0_29 = arith.constant 0 : index
    %c0_30 = arith.constant 0 : index
    %55 = vector.load %arg5[%c0_29, %c0_30] : memref<37x512xf32, #tpu.memory_space<vmem>>, vector<4x256xf32>
    tpu.vector_store %arg5[%c0_29, %c0_30], %54 {strides = array<i32>} : memref<37x512xf32, #tpu.memory_space<vmem>>, vector<4x256xf32>,
    %56 = vector.extract_strided_slice %51 {offsets = [0, 1], sizes = [4, 256], strides = [1, 1]} : vector<4x290xf32> to vector<4x256xf32>
    %c4 = arith.constant 4 : index
    %c0_31 = arith.constant 0 : index
    %57 = vector.load %arg5[%c4, %c0_31] : memref<37x512xf32, #tpu.memory_space<vmem>>, vector<4x256xf32>
    tpu.vector_store %arg5[%c4, %c0_31], %56 {strides = array<i32>} : memref<37x512xf32, #tpu.memory_space<vmem>>, vector<4x256xf32>,
    %58 = vector.extract_strided_slice %51 {offsets = [0, 2], sizes = [4, 256], strides = [1, 1]} : vector<4x290xf32> to vector<4x256xf32>
    %59 = vector.broadcast %24 : vector<1x256xf32> to vector<4x256xf32>
    %60 = arith.mulf %58, %59 : vector<4x256xf32>
    %c8 = arith.constant 8 : index
    %c0_32 = arith.constant 0 : index
    %61 = vector.load %arg5[%c8, %c0_32] : memref<37x512xf32, #tpu.memory_space<vmem>>, vector<4x256xf32>
    tpu.vector_store %arg5[%c8, %c0_32], %60 {strides = array<i32>} : memref<37x512xf32, #tpu.memory_space<vmem>>, vector<4x256xf32>,
    %62 = vector.extract_strided_slice %51 {offsets = [0, 16], sizes = [4, 256], strides = [1, 1]} : vector<4x290xf32> to vector<4x256xf32>
    %63 = vector.broadcast %20 : vector<1x256xf32> to vector<4x256xf32>
    %64 = arith.mulf %62, %63 : vector<4x256xf32>
    %c12 = arith.constant 12 : index
    %c0_33 = arith.constant 0 : index
    %65 = vector.load %arg5[%c12, %c0_33] : memref<37x512xf32, #tpu.memory_space<vmem>>, vector<4x256xf32>
    tpu.vector_store %arg5[%c12, %c0_33], %64 {strides = array<i32>} : memref<37x512xf32, #tpu.memory_space<vmem>>, vector<4x256xf32>,
    %66 = vector.extract_strided_slice %51 {offsets = [0, 17], sizes = [4, 256], strides = [1, 1]} : vector<4x290xf32> to vector<4x256xf32>
    %c16 = arith.constant 16 : index
    %c0_34 = arith.constant 0 : index
    %67 = vector.load %arg5[%c16, %c0_34] : memref<37x512xf32, #tpu.memory_space<vmem>>, vector<4x256xf32>
    tpu.vector_store %arg5[%c16, %c0_34], %66 {strides = array<i32>} : memref<37x512xf32, #tpu.memory_space<vmem>>, vector<4x256xf32>,
    %68 = vector.extract_strided_slice %51 {offsets = [0, 18], sizes = [4, 256], strides = [1, 1]} : vector<4x290xf32> to vector<4x256xf32>
    %69 = vector.broadcast %24 : vector<1x256xf32> to vector<4x256xf32>
    %70 = arith.mulf %68, %69 : vector<4x256xf32>
    %c20 = arith.constant 20 : index
    %c0_35 = arith.constant 0 : index
    %71 = vector.load %arg5[%c20, %c0_35] : memref<37x512xf32, #tpu.memory_space<vmem>>, vector<4x256xf32>
    tpu.vector_store %arg5[%c20, %c0_35], %70 {strides = array<i32>} : memref<37x512xf32, #tpu.memory_space<vmem>>, vector<4x256xf32>,
    %72 = vector.extract_strided_slice %51 {offsets = [0, 32], sizes = [4, 256], strides = [1, 1]} : vector<4x290xf32> to vector<4x256xf32>
    %73 = vector.broadcast %20 : vector<1x256xf32> to vector<4x256xf32>
    %74 = arith.mulf %72, %73 : vector<4x256xf32>
    %c24 = arith.constant 24 : index
    %c0_36 = arith.constant 0 : index
    %75 = vector.load %arg5[%c24, %c0_36] : memref<37x512xf32, #tpu.memory_space<vmem>>, vector<4x256xf32>
    tpu.vector_store %arg5[%c24, %c0_36], %74 {strides = array<i32>} : memref<37x512xf32, #tpu.memory_space<vmem>>, vector<4x256xf32>,
    %76 = vector.extract_strided_slice %51 {offsets = [0, 33], sizes = [4, 256], strides = [1, 1]} : vector<4x290xf32> to vector<4x256xf32>
    %c28 = arith.constant 28 : index
    %c0_37 = arith.constant 0 : index
    %77 = vector.load %arg5[%c28, %c0_37] : memref<37x512xf32, #tpu.memory_space<vmem>>, vector<4x256xf32>
    tpu.vector_store %arg5[%c28, %c0_37], %76 {strides = array<i32>} : memref<37x512xf32, #tpu.memory_space<vmem>>, vector<4x256xf32>,
    %78 = vector.extract_strided_slice %51 {offsets = [0, 34], sizes = [4, 256], strides = [1, 1]} : vector<4x290xf32> to vector<4x256xf32>
    %79 = vector.broadcast %24 : vector<1x256xf32> to vector<4x256xf32>
    %80 = arith.mulf %78, %79 : vector<4x256xf32>
    %c32 = arith.constant 32 : index
    %c0_38 = arith.constant 0 : index
    %81 = vector.load %arg5[%c32, %c0_38] : memref<37x512xf32, #tpu.memory_space<vmem>>, vector<4x256xf32>
    tpu.vector_store %arg5[%c32, %c0_38], %80 {strides = array<i32>} : memref<37x512xf32, #tpu.memory_space<vmem>>, vector<4x256xf32>,
    %c1_39 = arith.constant 1 : index
    %c0_40 = arith.constant 0 : index
    %c0_41 = arith.constant 0 : index
    %82 = vector.load %arg4[%c1_39, %c0_40, %c0_41] : memref<2x4x290xf32, #tpu.memory_space<vmem>>, vector<1x4x290xf32>
    %83 = vector.shape_cast %82 : vector<1x4x290xf32> to vector<4x290xf32>
    %84 = vector.extract_strided_slice %83 {offsets = [0, 0], sizes = [4, 256], strides = [1, 1]} : vector<4x290xf32> to vector<4x256xf32>
    %85 = vector.broadcast %20 : vector<1x256xf32> to vector<4x256xf32>
    %86 = arith.mulf %84, %85 : vector<4x256xf32>
    %c0_42 = arith.constant 0 : index
    %c256 = arith.constant 256 : index
    %87 = vector.load %arg5[%c0_42, %c256] : memref<37x512xf32, #tpu.memory_space<vmem>>, vector<4x256xf32>
    tpu.vector_store %arg5[%c0_42, %c256], %86 {strides = array<i32>} : memref<37x512xf32, #tpu.memory_space<vmem>>, vector<4x256xf32>,
    %88 = vector.extract_strided_slice %83 {offsets = [0, 1], sizes = [4, 256], strides = [1, 1]} : vector<4x290xf32> to vector<4x256xf32>
    %c4_43 = arith.constant 4 : index
    %c256_44 = arith.constant 256 : index
    %89 = vector.load %arg5[%c4_43, %c256_44] : memref<37x512xf32, #tpu.memory_space<vmem>>, vector<4x256xf32>
    tpu.vector_store %arg5[%c4_43, %c256_44], %88 {strides = array<i32>} : memref<37x512xf32, #tpu.memory_space<vmem>>, vector<4x256xf32>,
    %90 = vector.extract_strided_slice %83 {offsets = [0, 2], sizes = [4, 256], strides = [1, 1]} : vector<4x290xf32> to vector<4x256xf32>
    %91 = vector.broadcast %24 : vector<1x256xf32> to vector<4x256xf32>
    %92 = arith.mulf %90, %91 : vector<4x256xf32>
    %c8_45 = arith.constant 8 : index
    %c256_46 = arith.constant 256 : index
    %93 = vector.load %arg5[%c8_45, %c256_46] : memref<37x512xf32, #tpu.memory_space<vmem>>, vector<4x256xf32>
    tpu.vector_store %arg5[%c8_45, %c256_46], %92 {strides = array<i32>} : memref<37x512xf32, #tpu.memory_space<vmem>>, vector<4x256xf32>,
    %94 = vector.extract_strided_slice %83 {offsets = [0, 16], sizes = [4, 256], strides = [1, 1]} : vector<4x290xf32> to vector<4x256xf32>
    %95 = vector.broadcast %20 : vector<1x256xf32> to vector<4x256xf32>
    %96 = arith.mulf %94, %95 : vector<4x256xf32>
    %c12_47 = arith.constant 12 : index
    %c256_48 = arith.constant 256 : index
    %97 = vector.load %arg5[%c12_47, %c256_48] : memref<37x512xf32, #tpu.memory_space<vmem>>, vector<4x256xf32>
    tpu.vector_store %arg5[%c12_47, %c256_48], %96 {strides = array<i32>} : memref<37x512xf32, #tpu.memory_space<vmem>>, vector<4x256xf32>,
    %98 = vector.extract_strided_slice %83 {offsets = [0, 17], sizes = [4, 256], strides = [1, 1]} : vector<4x290xf32> to vector<4x256xf32>
    %c16_49 = arith.constant 16 : index
    %c256_50 = arith.constant 256 : index
    %99 = vector.load %arg5[%c16_49, %c256_50] : memref<37x512xf32, #tpu.memory_space<vmem>>, vector<4x256xf32>
    tpu.vector_store %arg5[%c16_49, %c256_50], %98 {strides = array<i32>} : memref<37x512xf32, #tpu.memory_space<vmem>>, vector<4x256xf32>,
    %100 = vector.extract_strided_slice %83 {offsets = [0, 18], sizes = [4, 256], strides = [1, 1]} : vector<4x290xf32> to vector<4x256xf32>
    %101 = vector.broadcast %24 : vector<1x256xf32> to vector<4x256xf32>
    %102 = arith.mulf %100, %101 : vector<4x256xf32>
    %c20_51 = arith.constant 20 : index
    %c256_52 = arith.constant 256 : index
    %103 = vector.load %arg5[%c20_51, %c256_52] : memref<37x512xf32, #tpu.memory_space<vmem>>, vector<4x256xf32>
    tpu.vector_store %arg5[%c20_51, %c256_52], %102 {strides = array<i32>} : memref<37x512xf32, #tpu.memory_space<vmem>>, vector<4x256xf32>,
    %104 = vector.extract_strided_slice %83 {offsets = [0, 32], sizes = [4, 256], strides = [1, 1]} : vector<4x290xf32> to vector<4x256xf32>
    %105 = vector.broadcast %20 : vector<1x256xf32> to vector<4x256xf32>
    %106 = arith.mulf %104, %105 : vector<4x256xf32>
    %c24_53 = arith.constant 24 : index
    %c256_54 = arith.constant 256 : index
    %107 = vector.load %arg5[%c24_53, %c256_54] : memref<37x512xf32, #tpu.memory_space<vmem>>, vector<4x256xf32>
    tpu.vector_store %arg5[%c24_53, %c256_54], %106 {strides = array<i32>} : memref<37x512xf32, #tpu.memory_space<vmem>>, vector<4x256xf32>,
    %108 = vector.extract_strided_slice %83 {offsets = [0, 33], sizes = [4, 256], strides = [1, 1]} : vector<4x290xf32> to vector<4x256xf32>
    %c28_55 = arith.constant 28 : index
    %c256_56 = arith.constant 256 : index
    %109 = vector.load %arg5[%c28_55, %c256_56] : memref<37x512xf32, #tpu.memory_space<vmem>>, vector<4x256xf32>
    tpu.vector_store %arg5[%c28_55, %c256_56], %108 {strides = array<i32>} : memref<37x512xf32, #tpu.memory_space<vmem>>, vector<4x256xf32>,
    %110 = vector.extract_strided_slice %83 {offsets = [0, 34], sizes = [4, 256], strides = [1, 1]} : vector<4x290xf32> to vector<4x256xf32>
    %111 = vector.broadcast %24 : vector<1x256xf32> to vector<4x256xf32>
    %112 = arith.mulf %110, %111 : vector<4x256xf32>
    %c32_57 = arith.constant 32 : index
    %c256_58 = arith.constant 256 : index
    %113 = vector.load %arg5[%c32_57, %c256_58] : memref<37x512xf32, #tpu.memory_space<vmem>>, vector<4x256xf32>
    tpu.vector_store %arg5[%c32_57, %c256_58], %112 {strides = array<i32>} : memref<37x512xf32, #tpu.memory_space<vmem>>, vector<4x256xf32>,
    %c0_59 = arith.constant 0 : index
    %c0_60 = arith.constant 0 : index
    %114 = vector.load %arg2[%c0_59, %c0_60] : memref<16x37xf32, #tpu.memory_space<vmem>>, vector<16x37xf32>
    %c0_61 = arith.constant 0 : index
    %c0_62 = arith.constant 0 : index
    %115 = vector.load %arg5[%c0_61, %c0_62] : memref<37x512xf32, #tpu.memory_space<vmem>>, vector<37x512xf32>
    %cst_63 = arith.constant dense<0.000000e+00> : vector<16x512xf32>
    %116 = tpu.matmul %114, %115, %cst_63 {dimension_numbers = #tpu.dot_dimension_numbers<[1], [0], [0], [1], [0, 0, 1, 1], [], []>} : vector<16x37xf32>, vector<37x512xf32>, vector<16x512xf32> -> vector<16x512xf32>
    %cst_64 = arith.constant 2.000000e+01 : f32
    %117 = vector.broadcast %cst_64 : f32 to vector<16x512xf32>
    %118 = arith.minimumf %116, %117 : vector<16x512xf32>
    %119 = math.exp %118 : vector<16x512xf32>
    %cst_65 = arith.constant 2.000000e+00 : f32
    %120 = vector.broadcast %cst_65 : f32 to vector<16x512xf32>
    %121 = arith.addf %119, %120 : vector<16x512xf32>
    %122 = arith.mulf %119, %121 : vector<16x512xf32>
    %123 = arith.mulf %116, %122 : vector<16x512xf32>
    %cst_66 = arith.constant 2.000000e+00 : f32
    %124 = vector.broadcast %cst_66 : f32 to vector<16x512xf32>
    %125 = arith.addf %122, %124 : vector<16x512xf32>
    %126 = tpu.reciprocal %125 : vector<16x512xf32> -> vector<16x512xf32>
    %127 = arith.mulf %123, %126 : vector<16x512xf32>
    %128 = vector.extract_strided_slice %127 {offsets = [0, 0], sizes = [16, 256], strides = [1, 1]} : vector<16x512xf32> to vector<16x256xf32>
    %c0_67 = arith.constant 0 : index
    %c0_68 = arith.constant 0 : index
    %c0_69 = arith.constant 0 : index
    %129 = vector.load %arg3[%c0_67, %c0_68, %c0_69] : memref<2x16x256xf32, #tpu.memory_space<vmem>>, vector<1x16x256xf32>
    %130 = vector.shape_cast %129 : vector<1x16x256xf32> to vector<16x256xf32>
    %131 = vector.shape_cast %128 : vector<16x256xf32> to vector<1x16x256xf32>
    tpu.vector_store %arg3[%c0_67, %c0_68, %c0_69], %131 {strides = array<i32>} : memref<2x16x256xf32, #tpu.memory_space<vmem>>, vector<1x16x256xf32>,
    %132 = vector.extract_strided_slice %127 {offsets = [0, 256], sizes = [16, 256], strides = [1, 1]} : vector<16x512xf32> to vector<16x256xf32>
    %c1_70 = arith.constant 1 : index
    %c0_71 = arith.constant 0 : index
    %c0_72 = arith.constant 0 : index
    %133 = vector.load %arg3[%c1_70, %c0_71, %c0_72] : memref<2x16x256xf32, #tpu.memory_space<vmem>>, vector<1x16x256xf32>
    %134 = vector.shape_cast %133 : vector<1x16x256xf32> to vector<16x256xf32>
    %135 = vector.shape_cast %132 : vector<16x256xf32> to vector<1x16x256xf32>
    tpu.vector_store %arg3[%c1_70, %c0_71, %c0_72], %135 {strides = array<i32>} : memref<2x16x256xf32, #tpu.memory_space<vmem>>, vector<1x16x256xf32>,
    return
  }
  func.func @transform_0(%arg0: i32) -> (i32, i32, i32) {
    %c0_i32 = arith.constant 0 : i32
    %c0_i32_0 = arith.constant 0 : i32
    %c0_i32_1 = arith.constant 0 : i32
    return %arg0, %c0_i32, %c0_i32_0 : i32, i32, i32
  }
  func.func @transform_1(%arg0: i32) -> (i32, i32) {
    %c0_i32 = arith.constant 0 : i32
    %c0_i32_0 = arith.constant 0 : i32
    %c0_i32_1 = arith.constant 0 : i32
    return %c0_i32, %c0_i32_0 : i32, i32
  }
  func.func @transform_2(%arg0: i32) -> (i32, i32, i32) {
    %c0_i32 = arith.constant 0 : i32
    %c0_i32_0 = arith.constant 0 : i32
    %c0_i32_1 = arith.constant 0 : i32
    return %arg0, %c0_i32, %c0_i32_0 : i32, i32, i32
  }
}

</mosaic_0001>

<bundles_post_ra>
// kernel: _upsample_block_impl.1
= control target key start
LH: loop header
LB: loop body
LE: loop exit
PB: predicated region body
PF: predicated region fallthrough
CT: control target
= control target key end

     0   :  { %v11_v0 = vlaneseq  ;;  %vm50_vm0 = vcmask 134144   ;;  %v779_v2 = vmov 0.0   ;;  %vm52_vm1 = vcmask 273544   ;;  %s780_s11 = smov 17   ;;  %s783_s14 = smov 32   ;;  %s1015_s0 = inlined_call_operand.vmem [shape: f32[2,4,256], index: 0, kind: input, shape index: {}]   ;;  %s1016_s1 = inlined_call_operand.vmem [shape: f32[16,37], index: 1, kind: input, shape index: {}]   ;;  %s1017_s2 = inlined_call_operand.vmem [shape: f32[2,16,256], index: 2, kind: output, shape index: {}]  }
   0x1   :  { %v54_v1 = vld [vmem:[%s1015_s0] sm:$0xff]  ;;  %51 = vst.msk [vmem:[#allocation2] sm:$0xf] %vm50_vm0, %v779_v2  ;;  %69 = vst.msk [vmem:[#allocation2 + $0xc] sm:$0xf] %vm50_vm0, %v779_v2  ;;  %594 = vmatprep.mubr.f32.mxu1 %v779_v2  ;;  %517 = vmatprep.mubr.f32.mxu0 %v779_v2  ;;  %v696_v4 = vld [vmem:[%s1015_s0 + $0x8] sm:$0xff] }
   0x2   :  { %56 = vrot.lane.b32.xlu0 %v54_v1, %s780_s11  ;;  %v12_v3 = vand.u32 127, %v11_v0  ;;  %vm84_vm2 = vcmp.lt.s32.totalorder %v11_v0, 512  ;;  %53 = vst.msk [vmem:[#allocation2 + $0x8] sm:$0xf] %vm52_vm1, %v779_v2  ;;  %70 = vst.msk [vmem:[#allocation2 + $0x14] sm:$0xf] %vm52_vm1, %v779_v2 }
   0x3   :  { %v781_v5 = vmov 1.0   ;;  %s782_s0 = smov 2   ;;  %s784_s15 = smov 16   ;;  %vm63_vm7 = vcmask 1043592   ;;  %vm64_vm8 = vcmask 1047556   ;;  %vm59_vm9 = vcmask 138240  }
   0x4   :  { %87 = vst.msk [vmem:[#allocation3 + $0x84] ss:$8 sm:$0xf] %vm84_vm2, %v781_v5  ;;  %v13_v6 = vadd.s32 128, %v12_v3  ;;  %v18_v7 = vand.u32 15, %v12_v3  ;;  %s785_s16 = smov 34   ;;  %vm65_vm10 = vmor %vm64_vm8, %vm63_vm7 }
   0x5   :  { %s786_s17 = smov 18   ;;  %s787_s18 = smov 111   ;;  %vm149_vm11 = vcmask 130048   ;;  %vm124_vm12 = vcmask 15360   ;;  %vm189_vm13 = vcmask 146432   ;;  %vm215_vm14 = vcmask 261120  }
   0x6   :  { %74 = vrot.lane.b32.xlu0 %v696_v4, %s780_s11  ;;  %v25_v8 = vand.u32 15, %v13_v6  ;;  %vm44_vm3 = vcmp.le.s32.totalorder %v18_v7, 14  ;;  %vm38_vm4 = vcmp.ge.s32.totalorder %v18_v7, 1  ;;  %s788_s19 = smov 127   ;;  %s789_s20 = smov 95   ;;  %vm253_vm15 = vcmask 277504  }
   0x7   :  { %v694_v9 = vsel %vm44_vm3, 1.0, %v779_v2  ;;  %v692_v10 = vsel %vm38_vm4, 1.0, %v779_v2  ;;  %s790_s21 = smov 126   ;;  %s791_s22 = smov 112   ;;  %vm243_vm1 = vcmask 777216   ;;  %vm179_vm2 = vcmask 908288  }
   0x8   :  { %vm45_vm5 = vcmp.le.s32.totalorder %v25_v8, 14  ;;  %vm39_vm6 = vcmp.ge.s32.totalorder %v25_v8, 1  ;;  %s792_s23 = smov 96   ;;  %s793_s24 = smov 110   ;;  %vm165_vm3 = vcmask 916480   ;;  %vm139_vm4 = vcmask 1031168  }
   0x9   :  { %v695_v11 = vsel %vm45_vm5, 1.0, %v779_v2  ;;  %v693_v12 = vsel %vm39_vm6, 1.0, %v779_v2  ;;  %s794_s25 = smov 94   ;;  %vm205_vm5 = vcmask 900096   ;;  %vm230_vm6 = vcmask 785408  }
   0xa   :  { %v120_v13 = vcombine.low %v694_v9, %v695_v11  ;;  %v93_v14 = vcombine.low %v692_v10, %v693_v12  ;;  %vm268_vm7 = vcmask 769024   ;;  %vm440_vm8 = vcmask 1044480  }
   0xc   :  { %121 = vrot.lane.b32.xlu1 %v120_v13, %s782_s0  ;;  %212 = vrot.lane.b32.xlu0 %v93_v14, %s783_s14 }
  0x10   :  { %146 = vrot.lane.b32.xlu1 %v93_v14, %s784_s15  ;;  %250 = vrot.lane.b32.xlu0 %v120_v13, %s785_s16 }
  0x14   :  { %186 = vrot.lane.b32.xlu1 %v120_v13, %s786_s17 }
  0x74   :  { %v57_v15 = vpop.permute.xlu0 %56 }
  0x75   :  { %v58_v16 = vrot.slane %v57_v15, 4 }
  0x77   :  { %v60_v17 = vsel %vm59_vm9, %v58_v16, %v57_v15  ;;  %67 = vst.msk [vmem:[#allocation2 + $0x8] sm:$0xf] %vm50_vm0, %v58_v16 }
  0x78   :  { %66 = vst.msk [vmem:[#allocation2] sm:$0xff] %vm65_vm10, %v60_v17  ;;  %v75_v18 = vpop.permute.xlu0 %74 }
  0x79   :  { %v76_v19 = vrot.slane %v75_v18, 4 }
  0x7b   :  { %v77_v20 = vsel %vm59_vm9, %v76_v19, %v75_v18  ;;  %81 = vst.msk [vmem:[#allocation2 + $0x14] sm:$0xf] %vm50_vm0, %v76_v19  ;;  %vm111_vm0 = vcmask 1039360   ;;  %vm433_vm9 = vcmask 302080  }
  0x7c   :  { %80 = vst.msk [vmem:[#allocation2 + $0xc] sm:$0xff] %vm65_vm10, %v77_v20 }
  0x7e   :  { %v830_v21 = vld [vmem:[#allocation2 + $0x8] sm:$0xf]  ;;  %v122_v31 = vpop.permute.xlu1 %121  ;;  %v213_v41 = vpop.permute.xlu0 %212 }
  0x7f   :  { %v832_v22 = vld [vmem:[#allocation2] sm:$0xff]  ;;  %177 = vrot.lane.b32.xlu0 %v830_v21, %s787_s18  ;;  %v104_v27 = vcombine.low %v830_v21, %v830_v21  ;;  %v123_v37 = vrot.slane %v122_v31, 4  ;;  %v214_v44 = vrot.slane %v213_v41, 4 }
  0x80   :  { %107 = vrot.lane.b32.xlu1 %v832_v22, %s788_s19  ;;  %v95_v23 = vmul.f32 %v93_v14, %v832_v22  ;;  %v103_v33 = vcombine.low %v832_v22, %v832_v22  ;;  %v172_v35 = vcombine.high %v832_v22, %v832_v22 }
  0x81   :  { %v129_v40 = vmul.f32 %v123_v37, %v830_v21  ;;  %v125_v48 = vsel %vm124_vm12, %v123_v37, %v122_v31  ;;  %v220_v49 = vmul.f32 %v214_v44, %v830_v21  ;;  %v216_v58 = vsel %vm215_vm14, %v214_v44, %v213_v41 }
  0x82   :  { %v838_v24 = vld [vmem:[#allocation2 + $0x14] sm:$0xf]  ;;  %v97_v25 = vcombine.high %v95_v23, %v95_v23  ;;  %99 = vst [vmem:[#allocation3] sm:$0xf] %v95_v23  ;;  %v147_v34 = vpop.permute.xlu1 %146  ;;  %v251_v51 = vpop.permute.xlu0 %250  ;;  %v128_v59 = vmul.f32 %v125_v48, %v832_v22  ;;  %v219_v61 = vmul.f32 %v216_v58, %v832_v22 }
  0x83   :  { %v840_v26 = vld [vmem:[#allocation2 + $0xc] sm:$0xff]  ;;  %339 = vrot.lane.b32.xlu0 %v838_v24, %s787_s18  ;;  %v286_v28 = vcombine.low %v838_v24, %v838_v24  ;;  %v148_v36 = vrot.slane %v147_v34, 4  ;;  %v300_v45 = vmul.f32 %v838_v24, %v123_v37  ;;  %v252_v53 = vrot.slane %v251_v51, 4 }
  0x84   :  { %289 = vrot.lane.b32.xlu1 %v840_v26, %s788_s19  ;;  %100 = vst [vmem:[#allocation3 + $0x8] sm:$0xf] %v97_v25  ;;  %v277_v29 = vmul.f32 %v840_v26, %v93_v14  ;;  %v285_v32 = vcombine.low %v840_v26, %v840_v26  ;;  %v334_v38 = vcombine.high %v840_v26, %v840_v26 }
  0x85   :  { %v150_v39 = vsel %vm149_vm11, %v148_v36, %v147_v34  ;;  %v299_v50 = vmul.f32 %v840_v26, %v125_v48  ;;  %v366_v54 = vmul.f32 %v838_v24, %v214_v44  ;;  %v258_v56 = vmul.f32 %v252_v53, %v830_v21 }
  0x86   :  { %v279_v30 = vcombine.high %v277_v29, %v277_v29  ;;  %281 = vst [vmem:[#allocation3 + $0x10] sm:$0xf] %v277_v29  ;;  %v153_v42 = vmul.f32 %v150_v39, %v832_v22  ;;  %v187_v43 = vpop.permute.xlu1 %186  ;;  %v316_v46 = vmul.f32 %v840_v26, %v150_v39  ;;  %v154_v60 = vmul.f32 %v148_v36, %v830_v21 }
  0x87   :  { %109 = vrot.lane.b32.xlu0 %v104_v27, %s788_s19  ;;  %v188_v47 = vrot.slane %v187_v43, 4  ;;  %v317_v63 = vmul.f32 %v838_v24, %v148_v36  ;;  %v365_v0 = vmul.f32 %v840_v26, %v216_v58  ;;  %v132_v4 = vcombine.high %v128_v59, %v128_v59 }
  0x88   :  { %239 = vrot.lane.b32.xlu1 %v832_v22, %s789_s20  ;;  %282 = vst [vmem:[#allocation3 + $0x18] sm:$0xf] %v279_v30  ;;  %v158_v62 = vcombine.low %v154_v60, %v154_v60  ;;  %v303_v7 = vcombine.high %v299_v50, %v299_v50  ;;  %v157_v9 = vcombine.low %v153_v42, %v153_v42 }
  0x89   :  { %v190_v52 = vsel %vm189_vm13, %v188_v47, %v187_v43  ;;  %v321_v1 = vcombine.low %v317_v63, %v317_v63  ;;  %v194_v3 = vmul.f32 %v188_v47, %v830_v21  ;;  %v348_v6 = vmul.f32 %v838_v24, %v188_v47 }
  0x8a   :  { %v193_v55 = vmul.f32 %v190_v52, %v832_v22  ;;  %v347_v57 = vmul.f32 %v840_v26, %v190_v52  ;;  %v320_v10 = vcombine.low %v316_v46, %v316_v46  ;;  %v223_v11 = vcombine.high %v219_v61, %v219_v61 }
  0x8b   :  { %291 = vrot.lane.b32.xlu0 %v286_v28, %s788_s19  ;;  %v198_v5 = vcombine.low %v194_v3, %v194_v3  ;;  %v352_v8 = vcombine.low %v348_v6, %v348_v6  ;;  %v254_v12 = vsel %vm253_vm15, %v252_v53, %v251_v51  ;;  %v369_v15 = vcombine.high %v365_v0, %v365_v0 }
  0x8c   :  { %384 = vrot.lane.b32.xlu1 %v840_v26, %s789_s20  ;;  %v197_v13 = vcombine.low %v193_v55, %v193_v55  ;;  %v257_v14 = vmul.f32 %v254_v12, %v832_v22  ;;  %v351_v16 = vcombine.low %v347_v57, %v347_v57  ;;  %v394_v17 = vmul.f32 %v840_v26, %v254_v12 }
  0x8d   :  { %v395_v19 = vmul.f32 %v838_v24, %v252_v53 }
  0x8e   :  { %v261_v18 = vcombine.high %v257_v14, %v257_v14  ;;  %v398_v20 = vcombine.high %v394_v17, %v394_v17 }
  0x8f   :  { %241 = vrot.lane.b32.xlu0 %v104_v27, %s789_s20 }
  0x90   :  { %173 = vrot.lane.b32.xlu1 %v832_v22, %s787_s18 }
  0x93   :  { %386 = vrot.lane.b32.xlu0 %v286_v28, %s789_s20 }
  0x94   :  { %335 = vrot.lane.b32.xlu1 %v840_v26, %s787_s18 }
  0x97   :  { %287 = vrot.lane.b32.xlu0 %v285_v32, %s788_s19 }
  0x98   :  { %105 = vrot.lane.b32.xlu1 %v103_v33, %s788_s19 }
  0x9b   :  { %237 = vrot.lane.b32.xlu0 %v103_v33, %s789_s20 }
  0x9c   :  { %175 = vrot.lane.b32.xlu1 %v172_v35, %s787_s18 }
  0x9f   :  { %382 = vrot.lane.b32.xlu0 %v285_v32, %s789_s20 }
  0xa0   :  { %337 = vrot.lane.b32.xlu1 %v334_v38, %s787_s18 }
  0xa3   :  { %137 = vrot.lane.b32.xlu0 %v129_v40, %s790_s21 }
  0xa4   :  { %161 = vrot.lane.b32.xlu1 %v153_v42, %s791_s22 }
  0xa7   :  { %308 = vrot.lane.b32.xlu0 %v300_v45, %s790_s21 }
  0xa8   :  { %324 = vrot.lane.b32.xlu1 %v316_v46, %s791_s22 }
  0xab   :  { %228 = vrot.lane.b32.xlu0 %v220_v49, %s792_s23 }
  0xac   :  { %304 = vrot.lane.b32.xlu1 %v299_v50, %s790_s21 }
  0xaf   :  { %374 = vrot.lane.b32.xlu0 %v366_v54, %s792_s23 }
  0xb0   :  { %201 = vrot.lane.b32.xlu1 %v193_v55, %s793_s24 }
  0xb3   :  { %266 = vrot.lane.b32.xlu0 %v258_v56, %s794_s25 }
  0xb4   :  { %355 = vrot.lane.b32.xlu1 %v347_v57, %s793_s24 }
  0xb7   :  { %133 = vrot.lane.b32.xlu0 %v128_v59, %s790_s21 }
  0xb8   :  { %224 = vrot.lane.b32.xlu1 %v219_v61, %s792_s23 }
  0xbb   :  { %163 = vrot.lane.b32.xlu0 %v158_v62, %s791_s22 }
  0xbc   :  { %370 = vrot.lane.b32.xlu1 %v365_v0, %s792_s23 }
  0xbf   :  { %326 = vrot.lane.b32.xlu0 %v321_v1, %s791_s22 }
  0xc0   :  { %135 = vrot.lane.b32.xlu1 %v132_v4, %s790_s21 }
  0xc3   :  { %203 = vrot.lane.b32.xlu0 %v198_v5, %s793_s24 }
  0xc4   :  { %306 = vrot.lane.b32.xlu1 %v303_v7, %s790_s21 }
  0xc7   :  { %357 = vrot.lane.b32.xlu0 %v352_v8, %s793_s24 }
  0xc8   :  { %159 = vrot.lane.b32.xlu1 %v157_v9, %s791_s22 }
  0xcb   :  { %322 = vrot.lane.b32.xlu0 %v320_v10, %s791_s22 }
  0xcc   :  { %226 = vrot.lane.b32.xlu1 %v223_v11, %s792_s23 }
  0xcf   :  { %199 = vrot.lane.b32.xlu0 %v197_v13, %s793_s24 }
  0xd0   :  { %372 = vrot.lane.b32.xlu1 %v369_v15, %s792_s23 }
  0xd3   :  { %353 = vrot.lane.b32.xlu0 %v351_v16, %s793_s24 }
  0xd4   :  { %264 = vrot.lane.b32.xlu1 %v261_v18, %s794_s25 }
  0xd7   :  { %403 = vrot.lane.b32.xlu0 %v395_v19, %s794_s25 }
  0xd8   :  { %401 = vrot.lane.b32.xlu1 %v398_v20, %s794_s25 }
  0xdb   :  { %399 = vrot.lane.b32.xlu0 %v394_v17, %s794_s25 }
  0xdc   :  { %262 = vrot.lane.b32.xlu1 %v257_v14, %s794_s25 }
  0xf1   :  { %v178_v21 = vpop.permute.xlu0 %177 }
  0xf2   :  { %v108_v22 = vpop.permute.xlu1 %107 }
  0xf5   :  { %v340_v23 = vpop.permute.xlu0 %339 }
  0xf6   :  { %v290_v25 = vpop.permute.xlu1 %289 }
  0xf9   :  { %v110_v26 = vpop.permute.xlu0 %109 }
  0xfa   :  { %v113_v27 = vsel %vm111_vm0, %v108_v22, %v110_v26  ;;  %v240_v28 = vpop.permute.xlu1 %239 }
  0xfb   :  { %117 = vst [vmem:[#allocation3 + $0x8] sm:$0xf0] %v113_v27 }
  0xfd   :  { %v292_v24 = vpop.permute.xlu0 %291 }
  0xfe   :  { %v294_v29 = vsel %vm111_vm0, %v290_v25, %v292_v24  ;;  %v385_v30 = vpop.permute.xlu1 %384 }
  0xff   :  { %298 = vst [vmem:[#allocation3 + $0x18] sm:$0xf0] %v294_v29 }
 0x101   :  { %v242_v31 = vpop.permute.xlu0 %241 }
 0x102   :  { %v245_v32 = vsel %vm243_vm1, %v240_v28, %v242_v31  ;;  %v174_v33 = vpop.permute.xlu1 %173  ;;  %v414_v17 = vld [vmem:[#allocation3 + $0x8] sm:$0xff] }
 0x103   :  { %249 = vst [vmem:[#allocation3 + $0x68] sm:$0xf0] %v245_v32 }
 0x105   :  { %v387_v34 = vpop.permute.xlu0 %386 }
 0x106   :  { %v389_v35 = vsel %vm243_vm1, %v385_v30, %v387_v34  ;;  %v336_v36 = vpop.permute.xlu1 %335  ;;  %v416_v26 = vld [vmem:[#allocation3 + $0x18] sm:$0xff] }
 0x107   :  { %393 = vst [vmem:[#allocation3 + $0x78] sm:$0xf0] %v389_v35 }
 0x109   :  { %v288_v37 = vpop.permute.xlu0 %287 }
 0x10a   :  { %v293_v38 = vsel %vm111_vm0, %v288_v37, %v290_v25  ;;  %v106_v39 = vpop.permute.xlu1 %105 }
 0x10b   :  { %297 = vst [vmem:[#allocation3 + $0x10] sm:$0xf0] %v293_v38  ;;  %v112_v40 = vsel %vm111_vm0, %v106_v39, %v108_v22 }
 0x10c   :  { %116 = vst [vmem:[#allocation3] sm:$0xf0] %v112_v40 }
 0x10d   :  { %v238_v41 = vpop.permute.xlu0 %237 }
 0x10e   :  { %v244_v42 = vsel %vm243_vm1, %v238_v41, %v240_v28  ;;  %v176_v43 = vpop.permute.xlu1 %175 }
 0x10f   :  { %248 = vst [vmem:[#allocation3 + $0x60] sm:$0xf0] %v244_v42  ;;  %v180_v44 = vsel %vm179_vm2, %v174_v33, %v176_v43  ;;  %v181_v45 = vsel %vm179_vm2, %v176_v43, %v178_v21 }
 0x110   :  { %184 = vst [vmem:[#allocation3 + $0x40] sm:$0xf] %v180_v44  ;;  %185 = vst [vmem:[#allocation3 + $0x48] sm:$0xf] %v181_v45 }
 0x111   :  { %v383_v46 = vpop.permute.xlu0 %382 }
 0x112   :  { %v388_v47 = vsel %vm243_vm1, %v383_v46, %v385_v30  ;;  %v338_v48 = vpop.permute.xlu1 %337  ;;  %v415_v39 = vld [vmem:[#allocation3 + $0x10] sm:$0xff] }
 0x113   :  { %392 = vst [vmem:[#allocation3 + $0x70] sm:$0xf0] %v388_v47  ;;  %v341_v49 = vsel %vm179_vm2, %v336_v36, %v338_v48  ;;  %v342_v50 = vsel %vm179_vm2, %v338_v48, %v340_v23  ;;  %v413_v33 = vld [vmem:[#allocation3] sm:$0xff] }
 0x114   :  { %345 = vst [vmem:[#allocation3 + $0x50] sm:$0xf] %v341_v49  ;;  %346 = vst [vmem:[#allocation3 + $0x58] sm:$0xf] %v342_v50 }
 0x115   :  { %v138_v51 = vpop.permute.xlu0 %137 }
 0x116   :  { %v162_v52 = vpop.permute.xlu1 %161 }
 0x119   :  { %v309_v53 = vpop.permute.xlu0 %308 }
 0x11a   :  { %v325_v54 = vpop.permute.xlu1 %324 }
 0x11d   :  { %v229_v55 = vpop.permute.xlu0 %228 }
 0x11e   :  { %v305_v56 = vpop.permute.xlu1 %304 }
 0x121   :  { %v375_v57 = vpop.permute.xlu0 %374 }
 0x122   :  { %v202_v58 = vpop.permute.xlu1 %201 }
 0x125   :  { %v924_v59 = vpop.permute.xlu0 %266 }
 0x126   :  { %v926_v60 = vpop.permute.xlu1 %355 }
 0x129   :  { %v134_v61 = vpop.permute.xlu0 %133 }
 0x12a   :  { %v225_v62 = vpop.permute.xlu1 %224 }
 0x12d   :  { %v164_v63 = vpop.permute.xlu0 %163 }
 0x12e   :  { %v167_v0 = vsel %vm165_vm3, %v162_v52, %v164_v63  ;;  %v371_v1 = vpop.permute.xlu1 %370 }
 0x12f   :  { %171 = vst [vmem:[#allocation3 + $0x28] sm:$0xf0] %v167_v0  ;;  %v411_v0 = vld [vmem:[%s1016_s1] sm:$0xff] }
 0x131   :  { %v327_v3 = vpop.permute.xlu0 %326 }
 0x132   :  { %v329_v4 = vsel %vm165_vm3, %v325_v54, %v327_v3  ;;  %v136_v5 = vpop.permute.xlu1 %135 }
 0x133   :  { %333 = vst [vmem:[#allocation3 + $0x38] sm:$0xf0] %v329_v4  ;;  %v140_v6 = vsel %vm139_vm4, %v134_v61, %v136_v5  ;;  %v141_v7 = vsel %vm139_vm4, %v136_v5, %v138_v51  ;;  %v412_v4 = vld [vmem:[%s1016_s1 + $0x8] sm:$0xff] }
 0x134   :  { %144 = vst [vmem:[#allocation3 + $0x20] sm:$0xf] %v140_v6  ;;  %145 = vst [vmem:[#allocation3 + $0x28] sm:$0xf] %v141_v7 }
 0x135   :  { %v204_v8 = vpop.permute.xlu0 %203 }
 0x136   :  { %v207_v9 = vsel %vm205_vm5, %v202_v58, %v204_v8  ;;  %v307_v10 = vpop.permute.xlu1 %306 }
 0x137   :  { %211 = vst [vmem:[#allocation3 + $0x48] sm:$0xf0] %v207_v9  ;;  %v310_v11 = vsel %vm139_vm4, %v305_v56, %v307_v10  ;;  %v311_v12 = vsel %vm139_vm4, %v307_v10, %v309_v53 }
 0x138   :  { %314 = vst [vmem:[#allocation3 + $0x30] sm:$0xf] %v310_v11  ;;  %315 = vst [vmem:[#allocation3 + $0x38] sm:$0xf] %v311_v12 }
 0x139   :  { %v358_v13 = vpop.permute.xlu0 %357 }
 0x13a   :  { %v360_v14 = vsel %vm205_vm5, %v926_v60, %v358_v13  ;;  %v160_v15 = vpop.permute.xlu1 %159 }
 0x13b   :  { %364 = vst [vmem:[#allocation3 + $0x58] sm:$0xf0] %v360_v14  ;;  %v166_v16 = vsel %vm165_vm3, %v160_v15, %v162_v52  ;;  %v418_v18 = vld [vmem:[#allocation3 + $0x28] sm:$0xff] }
 0x13c   :  { %170 = vst [vmem:[#allocation3 + $0x20] sm:$0xf0] %v166_v16  ;;  %v709_v19 = vpack.c.bf16 %v418_v18, %v414_v17 }
 0x13d   :  { %v323_v20 = vpop.permute.xlu0 %322 }
 0x13e   :  { %v328_v21 = vsel %vm165_vm3, %v323_v20, %v325_v54  ;;  %v227_v22 = vpop.permute.xlu1 %226  ;;  %710 = vmatprep.subr.bf16.mxu0 %v709_v19  ;;  %v422_v43 = vld [vmem:[#allocation3 + $0x48] sm:$0xff] }
 0x13f   :  { %332 = vst [vmem:[#allocation3 + $0x30] sm:$0xf0] %v328_v21  ;;  %v231_v23 = vsel %vm230_vm6, %v225_v62, %v227_v22  ;;  %v232_v25 = vsel %vm230_vm6, %v227_v22, %v229_v55  ;;  %v420_v27 = vld [vmem:[#allocation3 + $0x38] sm:$0xff] }
 0x140   :  { %235 = vst [vmem:[#allocation3 + $0x60] sm:$0xf] %v231_v23  ;;  %236 = vst [vmem:[#allocation3 + $0x68] sm:$0xf] %v232_v25  ;;  %v717_v28 = vpack.c.bf16 %v420_v27, %v416_v26 }
 0x141   :  { %v200_v24 = vpop.permute.xlu0 %199 }
 0x142   :  { %v206_v29 = vsel %vm205_vm5, %v200_v24, %v202_v58  ;;  %v373_v30 = vpop.permute.xlu1 %372  ;;  %718 = vmatprep.subr.bf16.mxu1 %v717_v28  ;;  %v424_v52 = vld [vmem:[#allocation3 + $0x58] sm:$0xff] }
 0x143   :  { %210 = vst [vmem:[#allocation3 + $0x40] sm:$0xf0] %v206_v29  ;;  %v376_v31 = vsel %vm230_vm6, %v371_v1, %v373_v30  ;;  %v377_v32 = vsel %vm230_vm6, %v373_v30, %v375_v57  ;;  %v417_v34 = vld [vmem:[#allocation3 + $0x20] sm:$0xff] }
 0x144   :  { %380 = vst [vmem:[#allocation3 + $0x70] sm:$0xf] %v376_v31  ;;  %381 = vst [vmem:[#allocation3 + $0x78] sm:$0xf] %v377_v32  ;;  %v711_v35 = vpack.c.bf16 %v417_v34, %v413_v33 }
 0x145   :  { %v354_v36 = vpop.permute.xlu0 %353 }
 0x146   :  { %v359_v37 = vsel %vm205_vm5, %v354_v36, %v926_v60  ;;  %v265_v38 = vpop.permute.xlu1 %264  ;;  %712 = vmatpush1.bf16.msra.mxu0 %v711_v35  ;;  %v419_v40 = vld [vmem:[#allocation3 + $0x30] sm:$0xff] }
 0x147   :  { %363 = vst [vmem:[#allocation3 + $0x50] sm:$0xf0] %v359_v37  ;;  %v270_v41 = vsel %vm268_vm7, %v265_v38, %v924_v59  ;;  %v719_v42 = vpack.c.bf16 %v419_v40, %v415_v39  ;;  %v426_v44 = vld [vmem:[#allocation3 + $0x68] sm:$0xff]  ;;  %v425_v49 = vld [vmem:[#allocation3 + $0x60] sm:$0xff] }
 0x148   :  { %274 = vst [vmem:[#allocation3 + $0x88] sm:$0xf] %v270_v41  ;;  %v713_v45 = vpack.c.bf16 %v426_v44, %v422_v43 }
 0x149   :  { %720 = vmatpush1.bf16.msra.mxu1 %v719_v42  ;;  %v404_v46 = vpop.permute.xlu0 %403 }
 0x14a   :  { %v402_v47 = vpop.permute.xlu1 %401  ;;  %714 = vmatprep.subr.bf16.mxu0 %v713_v45  ;;  %v421_v48 = vld [vmem:[#allocation3 + $0x40] sm:$0xff] }
 0x14b   :  { %v406_v50 = vsel %vm268_vm7, %v402_v47, %v404_v46  ;;  %v715_v51 = vpack.c.bf16 %v425_v49, %v421_v48  ;;  %v428_v53 = vld [vmem:[#allocation3 + $0x78] sm:$0xff]  ;;  %v427_v59 = vld [vmem:[#allocation3 + $0x70] sm:$0xff] }
 0x14c   :  { %410 = vst [vmem:[#allocation3 + $0x98] sm:$0xf] %v406_v50  ;;  %v721_v54 = vpack.c.bf16 %v428_v53, %v424_v52 }
 0x14d   :  { %716 = vmatpush1.bf16.msra.mxu0 %v715_v51  ;;  %v400_v55 = vpop.permute.xlu0 %399 }
 0x14e   :  { %v405_v56 = vsel %vm268_vm7, %v400_v55, %v402_v47  ;;  %v263_v57 = vpop.permute.xlu1 %262  ;;  %722 = vmatprep.subr.bf16.mxu1 %v721_v54  ;;  %v423_v58 = vld [vmem:[#allocation3 + $0x50] sm:$0xff] }
 0x14f   :  { %409 = vst [vmem:[#allocation3 + $0x90] sm:$0xf] %v405_v56  ;;  %v269_v60 = vsel %vm268_vm7, %v263_v57, %v265_v38  ;;  %v430_v61 = vld [vmem:[#allocation3 + $0x88] sm:$0x1f]  ;;  %v723_v62 = vpack.c.bf16 %v427_v59, %v423_v58 }
 0x150   :  { %273 = vst [vmem:[#allocation3 + $0x80] sm:$0xf] %v269_v60  ;;  %697 = vmatprep.subr.msk.mxu0 %vm440_vm8, %v430_v61 }
 0x151   :  { %724 = vmatpush1.bf16.msra.mxu1 %v723_v62 }
 0x153   :  { %v432_v63 = vld [vmem:[#allocation3 + $0x98] sm:$0x1f] }
 0x154   :  { %701 = vmatprep.subr.msk.mxu1 %vm440_vm8, %v432_v63 }
 0x156   :  { %v431_v1 = vld [vmem:[#allocation3 + $0x90] sm:$0x1f] }
 0x157   :  { %702 = vmatpush1.msk.msra.mxu1 %vm440_vm8, %v431_v1  ;;  %v429_v3 = vld [vmem:[#allocation3 + $0x80] sm:$0x1f] }
 0x158   :  { %698 = vmatpush1.msk.msra.mxu0 %vm440_vm8, %v429_v3  ;;  %703 = vmatmul.mubr.msk.f32.vlgmr.msra.gmra.mrb[0].mxu1 %vm433_vm9, %v411_v0 }
 0x159   :  { %699 = vmatmul.mubr.msk.f32.vlgmr.msra.gmra.mrb[0].mxu0 %vm433_vm9, %v411_v0  ;;  %600 = vmatprep.mubr.f32.mxu1 %v779_v2 }
 0x15a   :  { %523 = vmatprep.mubr.f32.mxu0 %v779_v2 }
 0x15c   :  { %704 = vmatmul.mubr.msk.f32.gmra.mrb[2].mxu1 %vm433_vm9, %v412_v4 }
 0x15d   :  { %700 = vmatmul.mubr.msk.f32.gmra.mrb[2].mxu0 %vm433_vm9, %v412_v4 }
 0x22b   :  { %v959_v5 = vpop.f32.mrb[0].mxu1 }
 0x22c   :  { %v609_v6 = vmin.f32 %v959_v5, 20.0  ;;  %v962_v7 = vpop.f32.mrb[0].mxu0  ;;  %v964_v8 = vpop.f32.mrb[1].mxu1 }
 0x22d   :  { %v607_v9 = vmin.f32 %v962_v7, 20.0  ;;  %v610_v10 = vmin.f32 %v964_v8, 20.0  ;;  %v968_v11 = vpop.f32.mrb[1].mxu0 }
 0x22e   :  { %v619_v12 = vmul.f32 1.442695, %v609_v6  ;;  %v608_v13 = vmin.f32 %v968_v11, 20.0 }
 0x22f   :  { %v615_v2 = vmul.f32 1.442695, %v607_v9  ;;  %v621_v14 = vmul.f32 1.442695, %v610_v10  ;;  %v971_v15 = vpop.f32.mrb[2].mxu1 }
 0x230   :  { %747 = vpow2.f32 %v619_v12  ;;  %v617_v16 = vmul.f32 1.442695, %v608_v13  ;;  %v613_v17 = vmin.f32 %v971_v15, 20.0  ;;  %v974_v18 = vpop.f32.mrb[2].mxu0  ;;  %v976_v19 = vpop.f32.mrb[3].mxu1 }
 0x231   :  { %749 = vpow2.f32 %v615_v2  ;;  %v611_v20 = vmin.f32 %v974_v18, 20.0  ;;  %v614_v21 = vmin.f32 %v976_v19, 20.0  ;;  %v980_v22 = vpop.f32.mrb[3].mxu0 }
 0x232   :  { %751 = vpow2.f32 %v621_v14  ;;  %v627_v23 = vmul.f32 1.442695, %v613_v17  ;;  %v612_v25 = vmin.f32 %v980_v22, 20.0 }
 0x233   :  { %753 = vpow2.f32 %v617_v16  ;;  %v623_v26 = vmul.f32 1.442695, %v611_v20  ;;  %v629_v27 = vmul.f32 1.442695, %v614_v21 }
 0x234   :  { %755 = vpow2.f32 %v627_v23  ;;  %v625_v28 = vmul.f32 1.442695, %v612_v25 }
 0x235   :  { %757 = vpow2.f32 %v623_v26 }
 0x236   :  { %759 = vpow2.f32 %v629_v27 }
 0x237   :  { %761 = vpow2.f32 %v625_v28 }
 0x23a   :  { %v748_v24 = vpop.eup %747 }
 0x23b   :  { %v750_v29 = vpop.eup %749  ;;  %v633_v30 = vadd.f32 2.0, %v748_v24 }
 0x23c   :  { %v752_v31 = vpop.eup %751  ;;  %v631_v32 = vadd.f32 2.0, %v750_v29 }
 0x23d   :  { %v754_v33 = vpop.eup %753  ;;  %v641_v34 = vmul.f32 %v748_v24, %v633_v30  ;;  %v634_v35 = vadd.f32 2.0, %v752_v31 }
 0x23e   :  { %v756_v36 = vpop.eup %755  ;;  %v639_v37 = vmul.f32 %v750_v29, %v631_v32  ;;  %v632_v38 = vadd.f32 2.0, %v754_v33 }
 0x23f   :  { %v758_v39 = vpop.eup %757  ;;  %v657_v40 = vadd.f32 2.0, %v641_v34  ;;  %v642_v41 = vmul.f32 %v752_v31, %v634_v35  ;;  %v637_v42 = vadd.f32 2.0, %v756_v36  ;;  %v649_v60 = vmul.f32 %v641_v34, %v959_v5 }
 0x240   :  { %v760_v43 = vpop.eup %759  ;;  %v655_v44 = vadd.f32 2.0, %v639_v37  ;;  %v640_v45 = vmul.f32 %v754_v33, %v632_v38  ;;  %v635_v46 = vadd.f32 2.0, %v758_v39  ;;  %v647_v62 = vmul.f32 %v639_v37, %v962_v7 }
 0x241   :  { %v762_v47 = vpop.eup %761  ;;  %763 = vrcp.f32 %v657_v40  ;;  %v658_v48 = vadd.f32 2.0, %v642_v41  ;;  %v645_v49 = vmul.f32 %v756_v36, %v637_v42  ;;  %v638_v53 = vadd.f32 2.0, %v760_v43 }
 0x242   :  { %765 = vrcp.f32 %v655_v44  ;;  %v656_v50 = vadd.f32 2.0, %v640_v45  ;;  %v643_v51 = vmul.f32 %v758_v39, %v635_v46  ;;  %v636_v55 = vadd.f32 2.0, %v762_v47 }
 0x243   :  { %767 = vrcp.f32 %v658_v48  ;;  %v661_v52 = vadd.f32 2.0, %v645_v49  ;;  %v646_v56 = vmul.f32 %v760_v43, %v638_v53  ;;  %v650_v1 = vmul.f32 %v642_v41, %v964_v8 }
 0x244   :  { %769 = vrcp.f32 %v656_v50  ;;  %v659_v54 = vadd.f32 2.0, %v643_v51  ;;  %v644_v57 = vmul.f32 %v762_v47, %v636_v55  ;;  %v648_v6 = vmul.f32 %v640_v45, %v968_v11 }
 0x245   :  { %771 = vrcp.f32 %v661_v52  ;;  %v662_v58 = vadd.f32 2.0, %v646_v56  ;;  %v653_v5 = vmul.f32 %v645_v49, %v971_v15  ;;  %v651_v8 = vmul.f32 %v643_v51, %v974_v18 }
 0x246   :  { %773 = vrcp.f32 %v659_v54  ;;  %v660_v59 = vadd.f32 2.0, %v644_v57  ;;  %v654_v14 = vmul.f32 %v646_v56, %v976_v19  ;;  %v652_v16 = vmul.f32 %v644_v57, %v980_v22 }
 0x247   :  { %775 = vrcp.f32 %v662_v58 }
 0x248   :  { %777 = vrcp.f32 %v660_v59 }
 0x24b   :  { %v764_v61 = vpop.eup %763 }
 0x24c   :  { %v766_v63 = vpop.eup %765  ;;  %v673_v0 = vmul.f32 %v764_v61, %v649_v60 }
 0x24d   :  { %v768_v3 = vpop.eup %767  ;;  %v671_v4 = vmul.f32 %v766_v63, %v647_v62 }
 0x24e   :  { %v770_v9 = vpop.eup %769  ;;  %705 = vst [vmem:[%s1017_s2 + $0x20] sm:$0xff] %v673_v0  ;;  %v674_v10 = vmul.f32 %v768_v3, %v650_v1 }
 0x24f   :  { %v772_v12 = vpop.eup %771  ;;  %679 = vst [vmem:[%s1017_s2] sm:$0xff] %v671_v4  ;;  %v672_v7 = vmul.f32 %v770_v9, %v648_v6 }
 0x250   :  { %v774_v13 = vpop.eup %773  ;;  %706 = vst [vmem:[%s1017_s2 + $0x28] sm:$0xff] %v674_v10  ;;  %v677_v11 = vmul.f32 %v772_v12, %v653_v5 }
 0x251   :  { %680 = vst [vmem:[%s1017_s2 + $0x8] sm:$0xff] %v672_v7  ;;  %v675_v2 = vmul.f32 %v774_v13, %v651_v8  ;;  %v776_v15 = vpop.eup %775 }
 0x252   :  { %707 = vst [vmem:[%s1017_s2 + $0x30] sm:$0xff] %v677_v11  ;;  %v778_v17 = vpop.eup %777  ;;  %v678_v18 = vmul.f32 %v776_v15, %v654_v14 }
 0x253   :  { %681 = vst [vmem:[%s1017_s2 + $0x10] sm:$0xff] %v675_v2  ;;  %v676_v20 = vmul.f32 %v778_v17, %v652_v16 }
 0x254   :  { %708 = vst [vmem:[%s1017_s2 + $0x38] sm:$0xff] %v678_v18 }
 0x255   :  { %682 = vst [vmem:[%s1017_s2 + $0x18] sm:$0xff] %v676_v20 }

</bundles_post_ra>
